<compile_context>
chip_gen: v7x
topology: tpu7x:2x2x1
jax: 0.10.0
libtpu: 0.0.40
codegen_flags: <defaults>
</compile_context>

<pallas_src>
import functools

import jax
import jax.numpy as jnp
from jax.experimental import pallas as pl
from jax.experimental.pallas import tpu as pltpu


def _pick_tile(dim, candidates):
    """Largest candidate tile that divides `dim`, else the full dim (keeps the
    (8,128) block constraint satisfied for any input size)."""
    for t in candidates:
        if dim % t == 0:
            return t
    return dim


def _vmem_limit_bytes(block_footprint_bytes):
    # actual footprint + headroom for double-buffer slack / internal scratch;
    # floor at 32 MiB, cap to stay reasonable across v5e/v6e (128 MiB) and
    # v7x (64 MiB physical VMEM).
    return int(min(max(block_footprint_bytes + (16 << 20), 32 << 20), 96 << 20))


# -----------------------------------------------------------------------------
# Tiled linear projection kernel:  out = x @ W + b
# -----------------------------------------------------------------------------
def _linear_kernel(x_ref, w_ref, b_ref, o_ref, acc_ref):
    @pl.when(pl.program_id(2) == 0)
    def _():
        acc_ref[...] = jnp.zeros_like(acc_ref)

    # native-dtype operands on the MXU, f32 accumulation
    acc_ref[...] += jnp.dot(x_ref[...], w_ref[...],
                            preferred_element_type=jnp.float32)

    @pl.when(pl.program_id(2) == pl.num_programs(2) - 1)
    def _():
        o_ref[...] = (acc_ref[...] + b_ref[...].astype(jnp.float32)).astype(o_ref.dtype)


def pallas_linear(x, w, b):
    """x: (M, Din), w: (Din, Dout), b: (Dout,) -> (M, Dout)."""
    M, Din = x.shape
    Dout = w.shape[1]
    tm = _pick_tile(M, (512, 256, 128, 64, 32, 16, 8))
    tn = _pick_tile(Dout, (512, 256, 128))
    tk = _pick_tile(Din, (2048, 1024, 512, 256, 128))
    grid = (M // tm, Dout // tn, Din // tk)

    isz = jnp.dtype(x.dtype).itemsize
    footprint = (2 * tm * tk * isz      # x block (double-buffered)
                 + 2 * tk * tn * isz    # w block
                 + 2 * tn * isz         # bias
                 + 2 * tm * tn * isz    # out block
                 + tm * tn * 4)         # f32 accumulator scratch

    return pl.pallas_call(
        _linear_kernel,
        out_shape=jax.ShapeDtypeStruct((M, Dout), x.dtype),
        grid_spec=pltpu.PrefetchScalarGridSpec(
            num_scalar_prefetch=0,
            grid=grid,
            in_specs=[
                pl.BlockSpec((tm, tk), lambda i, j, k: (i, k)),
                pl.BlockSpec((tk, tn), lambda i, j, k: (k, j)),
                pl.BlockSpec((1, tn), lambda i, j, k: (0, j)),
            ],
            out_specs=pl.BlockSpec((tm, tn), lambda i, j, k: (i, j)),
            scratch_shapes=[pltpu.VMEM((tm, tn), jnp.float32)],
        ),
        compiler_params=pltpu.CompilerParams(
            dimension_semantics=("parallel", "parallel", "arbitrary"),
            vmem_limit_bytes=_vmem_limit_bytes(footprint),
        ),
    )(x, w, b.reshape(1, Dout))


# -----------------------------------------------------------------------------
# Attention kernels: grid = (B, NQ_tiles).  q/k/v arrive as packed 5-D arrays
# (B, N, S, H, hd) (S = 1/2/3 projection slots); the kernel sees squeezed
# (tq, H, hd) / (NK, H, hd) tiles and indexes heads on the SUBLANE axis -- no
# lane slicing, no lane concatenation.
# -----------------------------------------------------------------------------
def _attn_heads(scaler, num_heads, q_ref, k_ref, v_ref):
    """Yields (h, o_h) with o_h the (tq, hd) f32 attention output of head h."""
    for h in range(num_heads):                       # static loop over heads
        qh = q_ref[:, h, :] * scaler                 # (tq, hd) sublane-indexed load
        kh = k_ref[:, h, :]                          # (NK, hd)
        vh = v_ref[:, h, :]                          # (NK, hd)
        s = jax.lax.dot_general(qh, kh, (((1,), (1,)), ((), ())),
                                preferred_element_type=jnp.float32)   # (tq, NK)
        s = s - jnp.max(s, axis=-1, keepdims=True)
        p = jnp.exp(s)                               # unnormalized probs (EUP)
        l = jnp.sum(p, axis=-1, keepdims=True)
        o_h = jnp.dot(p.astype(vh.dtype), vh,
                      preferred_element_type=jnp.float32)             # (tq, hd)
        # deferred softmax normalization: tq*hd muls instead of tq*NK
        o_h = o_h * pl.reciprocal(l, approx=True)
        yield h, o_h


def _attn_kernel(scaler, num_heads, q_ref, k_ref, v_ref, o_ref):
    for h, o_h in _attn_heads(scaler, num_heads, q_ref, k_ref, v_ref):
        o_ref[:, h, :] = o_h.astype(o_ref.dtype)     # sublane-indexed store


def _attn_oproj_kernel(scaler, num_heads, q_ref, k_ref, v_ref, wo_ref, bo_ref, o_ref):
    hd = q_ref.shape[-1]
    y = jnp.zeros(o_ref.shape, jnp.float32)          # (tq, odim)
    for h, o_h in _attn_heads(scaler, num_heads, q_ref, k_ref, v_ref):
        w_h = wo_ref[pl.ds(h * hd, hd), :]           # (hd, odim) sublane slice of Wo
        y = y + jnp.dot(o_h.astype(w_h.dtype), w_h,
                        preferred_element_type=jnp.float32)
    o_ref[...] = (y + bo_ref[...].astype(jnp.float32)).astype(o_ref.dtype)


def pallas_attention(q, q_slot, k, k_slot, v, v_slot, scaler, num_heads,
                     wo=None, bo=None):
    """q: (B, NQ, Sq, H, hd); k/v: (B, NK, Sk, H, hd) (may alias the same packed
    array).  Returns (B, NQ, H, hd), or (B, NQ, odim) when wo/bo are given."""
    B, NQ, _, H, hd = q.shape
    NK = k.shape[1]
    C = H * hd
    tq = _pick_tile(NQ, (256, 128, 64, 32, 16, 8))
    grid = (B, NQ // tq)

    in_specs = [
        pl.BlockSpec((None, tq, None, H, hd), lambda b, i, s=q_slot: (b, i, s, 0, 0)),
        pl.BlockSpec((None, NK, None, H, hd), lambda b, i, s=k_slot: (b, 0, s, 0, 0)),
        pl.BlockSpec((None, NK, None, H, hd), lambda b, i, s=v_slot: (b, 0, s, 0, 0)),
    ]
    operands = [q, k, v]

    isz = jnp.dtype(q.dtype).itemsize
    footprint = 2 * (tq + 2 * NK) * C * isz          # q/k/v blocks, double-buffered
    footprint += 2 * tq * NK * 4                     # live f32 score tile (spill room)

    if wo is not None:
        odim = wo.shape[1]
        kern = functools.partial(_attn_oproj_kernel, scaler, num_heads)
        in_specs += [
            pl.BlockSpec((C, odim), lambda b, i: (0, 0)),
            pl.BlockSpec((1, odim), lambda b, i: (0, 0)),
        ]
        operands += [wo, bo.reshape(1, odim)]
        out_shape = jax.ShapeDtypeStruct((B, NQ, odim), q.dtype)
        out_spec = pl.BlockSpec((None, tq, odim), lambda b, i: (b, i, 0))
        wsz = jnp.dtype(wo.dtype).itemsize
        footprint += 2 * (C + 1) * odim * wsz + 2 * tq * odim * isz + tq * odim * 4
    else:
        kern = functools.partial(_attn_kernel, scaler, num_heads)
        out_shape = jax.ShapeDtypeStruct((B, NQ, H, hd), q.dtype)
        out_spec = pl.BlockSpec((None, tq, H, hd), lambda b, i: (b, i, 0, 0))
        footprint += 2 * tq * C * isz

    return pl.pallas_call(
        kern,
        out_shape=out_shape,
        grid_spec=pltpu.PrefetchScalarGridSpec(
            num_scalar_prefetch=0,
            grid=grid,
            in_specs=in_specs,
            out_specs=out_spec,
        ),
        compiler_params=pltpu.CompilerParams(
            dimension_semantics=("parallel", "parallel"),
            vmem_limit_bytes=_vmem_limit_bytes(footprint),
        ),
    )(*operands)


# -----------------------------------------------------------------------------
# Module wrapper (parameter container + forward glue)
# -----------------------------------------------------------------------------
class MultiheadAttentionPallas:
    def __init__(self, embed_dim, num_heads=8, bias=True,
                 qdim=None, kdim=None, vdim=None, odim=None, o_proj=False,
                 key=None, dtype=jnp.float32):
        self.embed_dim = embed_dim
        self.num_heads = num_heads
        self.head_dim = embed_dim // num_heads
        assert self.head_dim * num_heads == embed_dim
        self.scaler = float(self.head_dim) ** (-0.5)
        self.qdim = qdim if qdim is not None else embed_dim
        self.kdim = kdim if kdim is not None else embed_dim
        self.vdim = vdim if vdim is not None else embed_dim
        self.odim = odim if odim is not None else embed_dim
        self.has_o_proj = bool(o_proj) or (self.odim != embed_dim)

        if key is None:
            key = jax.random.PRNGKey(0)
        ks = jax.random.split(key, 8)

        def init_linear(kw, kb, din, dout):
            bound = 1.0 / (din ** 0.5)
            w = jax.random.uniform(kw, (din, dout), dtype, -bound, bound)
            b = (jax.random.uniform(kb, (dout,), dtype, -bound, bound)
                 if bias else jnp.zeros((dout,), dtype))
            return w, b

        self.wq, self.bq = init_linear(ks[0], ks[1], self.qdim, embed_dim)
        self.wk, self.bk = init_linear(ks[2], ks[3], self.kdim, embed_dim)
        self.wv, self.bv = init_linear(ks[4], ks[5], self.vdim, embed_dim)
        if self.has_o_proj:
            self.wo, self.bo = init_linear(ks[6], ks[7], embed_dim, self.odim)
        else:
            self.wo, self.bo = None, None

        # Fused QKV weights (self-attention: one matmul instead of three).
        if self.qdim == self.kdim == self.vdim:
            self.wqkv = jnp.concatenate([self.wq, self.wk, self.wv], axis=1)
            self.bqkv = jnp.concatenate([self.bq, self.bk, self.bv], axis=0)
        else:
            self.wqkv, self.bqkv = None, None
        # Fused K|V weights (cross-attention with shared key/value tensor).
        if self.kdim == self.vdim:
            self.wkv = jnp.concatenate([self.wk, self.wv], axis=1)
            self.bkv = jnp.concatenate([self.bk, self.bv], axis=0)
        else:
            self.wkv, self.bkv = None, None

    def __call__(self, query, key, value, need_weights=False,
                 average_attn_weights=False, key_padding_mask=None, attn_mask=None):
        # TODO(synk): key_padding_mask / attn_mask additive masking not wired
        #             (this call pattern passes both as None); attn_drop / o_drop
        #             have p=0.0 and are identities.
        assert key_padding_mask is None and attn_mask is None, "masks not implemented"
        assert key.shape[:-1] == value.shape[:-1]
        B, NQ, _ = query.shape
        _, NK, _ = key.shape
        C, H, hd = self.embed_dim, self.num_heads, self.head_dim

        if self.wqkv is not None and (query is key) and (key is value):
            # self-attention: one fused (qdim, 3C) matmul; free contiguous reshape
            # to a packed (B, NQ, 3, H, hd) array -> no HBM-materializing slices.
            qkv = pallas_linear(query.reshape(B * NQ, self.qdim), self.wqkv, self.bqkv)
            pk = qkv.reshape(B, NQ, 3, H, hd)
            q_arr, qs, k_arr, ks_, v_arr, vs = pk, 0, pk, 1, pk, 2
        else:
            q = pallas_linear(query.reshape(B * NQ, self.qdim), self.wq, self.bq)
            q_arr, qs = q.reshape(B, NQ, 1, H, hd), 0
            if self.wkv is not None and (key is value):
                # cross-attention with shared K/V tensor: fused (kdim, 2C) matmul
                kv = pallas_linear(key.reshape(B * NK, self.kdim), self.wkv, self.bkv)
                kv = kv.reshape(B, NK, 2, H, hd)
                k_arr, ks_, v_arr, vs = kv, 0, kv, 1
            else:
                kk = pallas_linear(key.reshape(B * NK, self.kdim), self.wk, self.bk)
                vv = pallas_linear(value.reshape(B * NK, self.vdim), self.wv, self.bv)
                k_arr, ks_ = kk.reshape(B, NK, 1, H, hd), 0
                v_arr, vs = vv.reshape(B, NK, 1, H, hd), 0

        if self.has_o_proj:
            o = pallas_attention(q_arr, qs, k_arr, ks_, v_arr, vs, self.scaler, H,
                                 wo=self.wo, bo=self.bo)
        else:
            o = pallas_attention(q_arr, qs, k_arr, ks_, v_arr, vs, self.scaler, H)
            o = o.reshape(B, NQ, C)

        if need_weights:
            # weights recomputed in plain JAX only when explicitly requested
            qh = (q_arr[:, :, qs] * self.scaler).transpose(0, 2, 1, 3)
            kh = k_arr[:, :, ks_].transpose(0, 2, 1, 3)
            attn = jax.nn.softmax(jnp.einsum('bhqd,bhkd->bhqk', qh, kh), axis=-1)
            if average_attn_weights:
                attn = attn.mean(axis=1)
            return o, attn
        return o, None


# -----------------------------------------------------------------------------
# Pure-JAX reference for correctness check
# -----------------------------------------------------------------------------
def reference_forward(m, query, key, value):
    B, NQ, _ = query.shape
    _, NK, _ = key.shape
    H, hd, C = m.num_heads, m.head_dim, m.embed_dim
    q = query @ m.wq + m.bq
    k = key @ m.wk + m.bk
    v = value @ m.wv + m.bv
    q = q.reshape(B, NQ, H, hd).transpose(0, 2, 1, 3)
    k = k.reshape(B, NK, H, hd).transpose(0, 2, 1, 3)
    v = v.reshape(B, NK, H, hd).transpose(0, 2, 1, 3)
    s = jnp.einsum('bhqd,bhkd->bhqk', q, k) * m.scaler
    p = jax.nn.softmax(s, axis=-1)
    o = jnp.einsum('bhqk,bhkd->bhqd', p, v)
    o = o.transpose(0, 2, 1, 3).reshape(B, NQ, C)
    if m.has_o_proj:
        o = o @ m.wo + m.bo
    return o


if __name__ == "__main__":
    root = jax.random.PRNGKey(0)
    k_p1, k_p2, k_q, k_k, k_v, k_x = jax.random.split(root, 6)

    # --- cross-attention (separate q/k/v projections, no o_proj) -------------
    B, NQ, NK = 2, 8, 8
    embed_dim = 32
    mha = MultiheadAttentionPallas(embed_dim, num_heads=8, key=k_p1)

    query = jax.random.normal(k_q, (B, NQ, embed_dim), jnp.float32)
    key_ = jax.random.normal(k_k, (B, NK, embed_dim), jnp.float32)
    value = jax.random.normal(k_v, (B, NK, embed_dim), jnp.float32)

    out, _ = mha(query, key_, value)
    out = jax.block_until_ready(out)
    ref = reference_forward(mha, query, key_, value)
    assert out.shape == (B, NQ, embed_dim)
    assert jnp.allclose(out, ref, atol=2e-3, rtol=2e-3), "cross-attention mismatch"

    # --- cross-attention with shared key/value tensor (fused K|V projection) -
    out_kv, _ = mha(query, key_, key_)
    out_kv = jax.block_until_ready(out_kv)
    ref_kv = reference_forward(mha, query, key_, key_)
    assert jnp.allclose(out_kv, ref_kv, atol=2e-3, rtol=2e-3), "fused-KV mismatch"

    # --- self-attention (fused QKV) with fused output projection -------------
    mha2 = MultiheadAttentionPallas(embed_dim, num_heads=4, o_proj=True, odim=64, key=k_p2)
    x = jax.random.normal(k_x, (B, NQ, embed_dim), jnp.float32)
    out2, _ = mha2(x, x, x)
    out2 = jax.block_until_ready(out2)
    ref2 = reference_forward(mha2, x, x, x)
    assert out2.shape == (B, NQ, 64)
    assert jnp.allclose(out2, ref2, atol=2e-3, rtol=2e-3), "self-attention mismatch"

    print("KERNEL_OK")
</pallas_src>

<mosaic_0001>
module attributes {stable_mosaic.version = 11 : i64} {
  func.func @_linear_kernel(%arg0: i32, %arg1: i32, %arg2: i32, %arg3: memref<16x32xf32, #tpu.memory_space<vmem>>, %arg4: memref<32x32xf32, #tpu.memory_space<vmem>>, %arg5: memref<1x32xf32, #tpu.memory_space<vmem>>, %arg6: memref<16x32xf32, #tpu.memory_space<vmem>>, %arg7: memref<16x32xf32, #tpu.memory_space<vmem>>) attributes {dimension_semantics = [#tpu.dimension_semantics<parallel>, #tpu.dimension_semantics<parallel>, #tpu.dimension_semantics<arbitrary>], iteration_bounds = array<i64: 1, 1, 1>, scalar_prefetch = 0 : i64, scratch_operands = 1 : i64, tpu.core_type = #tpu.core_type<tc>, window_params = [{transform_indices = @transform_0, window_bounds = array<i64: 16, 32>}, {transform_indices = @transform_1, window_bounds = array<i64: 32, 32>}, {transform_indices = @transform_2, window_bounds = array<i64: 1, 32>}, {transform_indices = @transform_3, window_bounds = array<i64: 16, 32>}]} {
    %c0_i32 = arith.constant 0 : i32
    %0 = arith.cmpi eq, %arg2, %c0_i32 : i32
    %1 = arith.extui %0 : i1 to i32
    %c0_i32_0 = arith.constant 0 : i32
    %2 = arith.cmpi ne, %1, %c0_i32_0 : i32
    scf.if %2 {
      %cst_10 = arith.constant 0.000000e+00 : f32
      %12 = vector.broadcast %cst_10 : f32 to vector<16x32xf32>
      %c0_11 = arith.constant 0 : index
      %c0_12 = arith.constant 0 : index
      %13 = vector.load %arg7[%c0_11, %c0_12] : memref<16x32xf32, #tpu.memory_space<vmem>>, vector<16x32xf32>
      tpu.vector_store %arg7[%c0_11, %c0_12], %12 {strides = array<i32>} : memref<16x32xf32, #tpu.memory_space<vmem>>, vector<16x32xf32>,
    } else {
    }
    %c0 = arith.constant 0 : index
    %c0_1 = arith.constant 0 : index
    %3 = vector.load %arg7[%c0, %c0_1] : memref<16x32xf32, #tpu.memory_space<vmem>>, vector<16x32xf32>
    %c0_2 = arith.constant 0 : index
    %c0_3 = arith.constant 0 : index
    %4 = vector.load %arg3[%c0_2, %c0_3] : memref<16x32xf32, #tpu.memory_space<vmem>>, vector<16x32xf32>
    %c0_4 = arith.constant 0 : index
    %c0_5 = arith.constant 0 : index
    %5 = vector.load %arg4[%c0_4, %c0_5] : memref<32x32xf32, #tpu.memory_space<vmem>>, vector<32x32xf32>
    %cst = arith.constant dense<0.000000e+00> : vector<16x32xf32>
    %6 = tpu.matmul %4, %5, %cst {dimension_numbers = #tpu.dot_dimension_numbers<[1], [0], [0], [1], [0, 0, 1, 1], [], []>} : vector<16x32xf32>, vector<32x32xf32>, vector<16x32xf32> -> vector<16x32xf32>
    %7 = arith.addf %3, %6 : vector<16x32xf32>
    %c0_6 = arith.constant 0 : index
    %c0_7 = arith.constant 0 : index
    %8 = vector.load %arg7[%c0_6, %c0_7] : memref<16x32xf32, #tpu.memory_space<vmem>>, vector<16x32xf32>
    tpu.vector_store %arg7[%c0_6, %c0_7], %7 {strides = array<i32>} : memref<16x32xf32, #tpu.memory_space<vmem>>, vector<16x32xf32>,
    %c0_i32_8 = arith.constant 0 : i32
    %9 = arith.cmpi eq, %arg2, %c0_i32_8 : i32
    %10 = arith.extui %9 : i1 to i32
    %c0_i32_9 = arith.constant 0 : i32
    %11 = arith.cmpi ne, %10, %c0_i32_9 : i32
    scf.if %11 {
      %c0_10 = arith.constant 0 : index
      %c0_11 = arith.constant 0 : index
      %12 = vector.load %arg7[%c0_10, %c0_11] : memref<16x32xf32, #tpu.memory_space<vmem>>, vector<16x32xf32>
      %c0_12 = arith.constant 0 : index
      %c0_13 = arith.constant 0 : index
      %13 = vector.load %arg5[%c0_12, %c0_13] : memref<1x32xf32, #tpu.memory_space<vmem>>, vector<1x32xf32>
      %14 = vector.broadcast %13 : vector<1x32xf32> to vector<16x32xf32>
      %15 = arith.addf %12, %14 : vector<16x32xf32>
      %c0_14 = arith.constant 0 : index
      %c0_15 = arith.constant 0 : index
      %16 = vector.load %arg6[%c0_14, %c0_15] : memref<16x32xf32, #tpu.memory_space<vmem>>, vector<16x32xf32>
      tpu.vector_store %arg6[%c0_14, %c0_15], %15 {strides = array<i32>} : memref<16x32xf32, #tpu.memory_space<vmem>>, vector<16x32xf32>,
    } else {
    }
    return
  }
  func.func @transform_0(%arg0: i32, %arg1: i32, %arg2: i32) -> (i32, i32) {
    %c0_i32 = arith.constant 0 : i32
    return %arg0, %arg2 : i32, i32
  }
  func.func @transform_1(%arg0: i32, %arg1: i32, %arg2: i32) -> (i32, i32) {
    %c0_i32 = arith.constant 0 : i32
    return %arg2, %arg1 : i32, i32
  }
  func.func @transform_2(%arg0: i32, %arg1: i32, %arg2: i32) -> (i32, i32) {
    %c0_i32 = arith.constant 0 : i32
    %c0_i32_0 = arith.constant 0 : i32
    return %c0_i32, %arg1 : i32, i32
  }
  func.func @transform_3(%arg0: i32, %arg1: i32, %arg2: i32) -> (i32, i32) {
    %c0_i32 = arith.constant 0 : i32
    return %arg0, %arg1 : i32, i32
  }
}

</mosaic_0001>

<bundles_post_ra>
// kernel: tpu_custom_call.1
= control target key start
LH: loop header
LB: loop body
LE: loop exit
PB: predicated region body
PF: predicated region fallthrough
CT: control target
= control target key end

     0   :  { %8 = vsyncpa [#allocation4], 0  ;;  %s366_s0 = inlined_call_operand.hbm [shape: f32[16,32], index: 0, kind: input, shape index: {}]   ;;  %s367_s1 = inlined_call_operand.hbm [shape: f32[32,32], index: 1, kind: input, shape index: {}]   ;;  %s368_s2 = inlined_call_operand.vmem [shape: f32[1,32], index: 2, kind: input, shape index: {}]   ;;  %s369_s3 = inlined_call_operand.hbm [shape: f32[16,32], index: 3, kind: output, shape index: {}]  }
   0x1   :  { %9 = vsyncpa [#allocation7], 0 }
   0x2   :  { %10 = vsyncpa [#allocation5], 0  ;;  %s284_s12 = smov [#allocation3]   ;;  %s212_s16 = scalar_lea.hbm %s366_s0, 256 }
   0x3   :  { %s16_s13 = sshll.u32 %s284_s12, 4  ;;  %p213_p0 = scmp.ne.s32.totalorder %s366_s0, %s212_s16  ;;  %s17_s13 = int_to_ptr.vmem [resolvable:$true] %s16_s13 }
   0x4   :  { %p216_p1 = scmp.lt.u32.totalorder %s212_s16, %s366_s0 }
   0x6   :  { %p218_p2 = pnand %p216_p1, %p213_p0 }
   0x8   :  { %221 = shalt.err (!%p218_p2)
}
   0x9   :  { %s222_s21 = scalar_lea.vmem %s17_s13, 256  ;;  %p227_p4 = scmp.lt.s32.totalorder %s17_s13, %s17_s13 }
   0xa   :  { %p223_p3 = scmp.ne.s32.totalorder %s17_s13, %s222_s21  ;;  %p228_p5 = scmp.lt.s32.totalorder %s222_s21, %s222_s21 }
   0xc   :  { %p229_p6 = por %p228_p5, %p227_p4 }
   0xe   :  { %p230_p7 = pnand %p229_p6, %p223_p3 }
  0x10   :  { %233 = shalt.err (!%p230_p7)
}
  0x11   :  { %s285_s22 = smov 128   ;;  %s286_s23 = smov 8  }
  0x12   :  { %22 = dma.hbm_to_vmem [thread:$0]  %s366_s0, 256, %s17_s13, [#allocation4], %s285_s22, %s285_s22, %s286_s23  }
  0x13   :  { %s287_s26 = smov [#allocation6]   ;;  %s234_s30 = scalar_lea.hbm %s367_s1, 512 }
  0x14   :  { %s28_s27 = sshll.u32 %s287_s26, 4  ;;  %p235_p8 = scmp.ne.s32.totalorder %s367_s1, %s234_s30  ;;  %s29_s27 = int_to_ptr.vmem [resolvable:$true] %s28_s27 }
  0x15   :  { %p238_p9 = scmp.lt.u32.totalorder %s234_s30, %s367_s1 }
  0x17   :  { %p240_p10 = pnand %p238_p9, %p235_p8 }
  0x19   :  { %243 = shalt.err (!%p240_p10)
}
  0x1a   :  { %s244_s8 = scalar_lea.vmem %s29_s27, 512  ;;  %p249_p12 = scmp.lt.s32.totalorder %s29_s27, %s29_s27 }
  0x1b   :  { %p245_p11 = scmp.ne.s32.totalorder %s29_s27, %s244_s8  ;;  %p250_p13 = scmp.lt.s32.totalorder %s244_s8, %s244_s8 }
  0x1d   :  { %p251_p0 = por %p250_p13, %p249_p12 }
  0x1f   :  { %p252_p1 = pnand %p251_p0, %p245_p11 }
  0x21   :  { %255 = shalt.err (!%p252_p1)
}
  0x22   :  { %34 = dma.hbm_to_vmem [thread:$0]  %s367_s1, 512, %s29_s27, [#allocation7], %s285_s22, %s285_s22, %s286_s23  }
  0x23   :  { %278 = dma.done.wait [#allocation4], 256  }
  0x24   :  { %279 = vsyncadd [#allocation4], 4294967040 }
  0x25   :  { %280 = dma.done.wait [#allocation7], 512  }
  0x26   :  { %281 = vsyncadd [#allocation7], 4294966784  ;;  %vm47_vm0 = vcmask 261120   ;;  %v288_v0 = vmov 0.0   ;;  %v54_v1 = vld [vmem:[#allocation6] sm:$0xff]  ;;  %v55_v2 = vld [vmem:[#allocation6 + $0x8] sm:$0xff] }
  0x27   :  { %49 = vst.msk [vmem:[#allocation2 + $0x8] sm:$0xff] %vm47_vm0, %v288_v0  ;;  %48 = vst.msk [vmem:[#allocation2] sm:$0xff] %vm47_vm0, %v288_v0  ;;  %v56_v3 = vld [vmem:[#allocation6 + $0x10] sm:$0xff]  ;;  %v198_v4 = vpack.c.bf16 %v55_v2, %v54_v1  ;;  %v57_v5 = vld [vmem:[#allocation6 + $0x18] sm:$0xff]  ;;  %s289_s11 = smov [#allocation8]  }
  0x28   :  { %v52_v6 = vld [vmem:[#allocation3] sm:$0xff]  ;;  %v202_v7 = vpack.c.bf16 %v57_v5, %v56_v3  ;;  %v53_v8 = vld [vmem:[#allocation3 + $0x8] sm:$0xff]  ;;  %v180_v15 = vld [vmem:[%s368_s2] ss:$0 sm:$0xff]  ;;  %s165_s12 = sshll.u32 %s289_s11, 4  ;;  %s166_s12 = int_to_ptr.vmem [resolvable:$true] %s165_s12 }
  0x29   :  { %195 = vmatprep.mubr.msk.f32.mxu0 %vm47_vm0, %v52_v6  ;;  %199 = vmatprep.subr.bf16.mxu0 %v198_v4  ;;  %s256_s13 = scalar_lea.vmem %s166_s12, 256  ;;  %p261_p3 = scmp.lt.s32.totalorder %s166_s12, %s166_s12 }
  0x2a   :  { %201 = vmatpush3.bf16.msra.mxu0 %v198_v4  ;;  %p257_p2 = scmp.ne.s32.totalorder %s166_s12, %s256_s13  ;;  %p262_p4 = scmp.lt.s32.totalorder %s256_s13, %s256_s13 }
  0x2b   :  { %203 = vmatprep.subr.bf16.mxu0 %v202_v7 }
  0x2c   :  { %p263_p5 = por %p262_p4, %p261_p3 }
  0x2e   :  { %205 = vmatpush3.bf16.msra.mxu0 %v202_v7  ;;  %v51_v9 = vld [vmem:[#allocation2 + $0x8] sm:$0xff]  ;;  %v50_v10 = vld [vmem:[#allocation2] sm:$0xff]  ;;  %p264_p6 = pnand %p263_p5, %p257_p2 }
  0x31   :  { %196 = vmatmul.mubr.msk.f32.vlgmr.msra.gmra.mrb[0].mxu0 %vm47_vm0, %v53_v8 }
 0x104   :  { %v197_v11 = vpop.f32.mrb[0].mxu0 }
 0x105   :  { %v141_v12 = vadd.f32 %v197_v11, %v51_v9  ;;  %v131_v13 = vpop.f32.mrb[1].mxu0 }
 0x106   :  { %v140_v14 = vadd.f32 %v131_v13, %v50_v10 }
 0x107   :  { %143 = vst.msk [vmem:[#allocation2 + $0x8] sm:$0xff] %vm47_vm0, %v141_v12 }
 0x108   :  { %142 = vst.msk [vmem:[#allocation2] sm:$0xff] %vm47_vm0, %v140_v14 }
 0x10e   :  { %v148_v16 = vld [vmem:[#allocation2 + $0x8] sm:$0xff] }
 0x10f   :  { %v147_v17 = vld [vmem:[#allocation2] sm:$0xff]  ;;  %v157_v18 = vadd.f32 %v180_v15, %v148_v16 }
 0x110   :  { %v156_v19 = vadd.f32 %v180_v15, %v147_v17 }
 0x111   :  { %159 = vst.msk [vmem:[#allocation8 + $0x8] sm:$0xff] %vm47_vm0, %v157_v18 }
 0x112   :  { %158 = vst.msk [vmem:[#allocation8] sm:$0xff] %vm47_vm0, %v156_v19 }
 0x113   :  { %267 = shalt.err (!%p264_p6)
}
 0x114   :  { %s268_s15 = scalar_lea.hbm %s369_s3, 256 }
 0x115   :  { %p269_p7 = scmp.ne.s32.totalorder %s369_s3, %s268_s15  ;;  %p272_p8 = scmp.lt.u32.totalorder %s268_s15, %s369_s3 }
 0x117   :  { %p274_p9 = pnand %p272_p8, %p269_p7 }
 0x119   :  { %277 = shalt.err (!%p274_p9)
}
 0x11a   :  { %171 = dma.vmem_to_hbm [thread:$0]  %s166_s12, 256, %s369_s3, [#allocation5], %s285_s22, %s285_s22, %s286_s23  }
 0x11b   :  { %282 = dma.done.wait [#allocation5], 256  }
 0x11c   :  { %283 = vsyncadd [#allocation5], 4294967040 }
 0x11d   :  { %175 = vsyncpa [#allocation4], 1 }
 0x11e   :  { %176 = vsyncpa [#allocation7], 1 }
 0x11f   :  { %177 = vsyncpa [#allocation5], 1 }

</bundles_post_ra>
